<compile_context>
chip_gen: v7x
topology: tpu7x:2x2x1
jax: 0.10.0
libtpu: 0.0.40
codegen_flags: <defaults>
</compile_context>

<pallas_src>
import jax
import jax.numpy as jnp
from jax.experimental import pallas as pl
from jax.experimental.pallas import tpu as pltpu

INPUT_DIM = 10        # len(features) in the reference module
H1, H2, OUT = 64, 32, 1
MAX_TILE_B = 16384    # f32 x tile 2x640 KB + ~6 MB f32 intermediates << VMEM limit


def _cdiv(a, b):
    return (a + b - 1) // b


def _round_up(n, m):
    return ((n + m - 1) // m) * m


def _choose_tile(batch, max_tile_b):
    """Pad-aware batch tile size + grid length."""
    if batch <= 128:
        # Single full-array block: exact shapes, no padded compute at all.
        return batch, 1
    n_tiles = _cdiv(batch, max_tile_b)
    if n_tiles == 1:
        n_tiles = 2  # give v7x's second TensorCore a grid step to run
    tile_b = _round_up(_cdiv(batch, n_tiles), 128)
    return tile_b, _cdiv(batch, tile_b)


def _xavier_uniform(key, out_features, in_features, dtype=jnp.float32):
    # matches torch.nn.init.xavier_uniform_ (gain=1) on an (out, in) Linear weight
    bound = (6.0 / (in_features + out_features)) ** 0.5
    return jax.random.uniform(key, (out_features, in_features), dtype,
                              minval=-bound, maxval=bound)


def mlp_kernel(x_ref, w1_ref, b1_ref, w2_ref, b2_ref, w3_ref, b3_ref, o_ref):
    """Fused MLP: out = W3 @ relu(W2 @ relu(W1 @ x^T + b1) + b2) + b3.

    x_ref : (TILE_B, F)   f32  natural layout, streamed per grid step
    w*    : (out, in)     f32  VMEM-resident across the grid (constant index_map)
    b1/b2 : (out, 1)      f32  VMEM-resident
    b3    : (1,)          f32  SMEM scalar
    o_ref : (OUT, TILE_B) f32  lane-dense store
    """
    x = x_ref[...]
    # Layer 1: contract the feature axis of both operands (MXU transposed-RHS
    # path, same pattern as q@k^T in attention); activations come out
    # batch-on-lanes so everything downstream, including the store, is lane-dense.
    h1 = jnp.einsum('hf,bf->hb', w1_ref[...], x,
                    preferred_element_type=jnp.float32)               # (H1, TILE_B)
    h1 = jnp.maximum(h1 + b1_ref[...], 0.0)
    h2 = jnp.dot(w2_ref[...], h1, preferred_element_type=jnp.float32)  # (H2, TILE_B)
    h2 = jnp.maximum(h2 + b2_ref[...], 0.0)
    o_ref[...] = jnp.dot(w3_ref[...], h2,
                         preferred_element_type=jnp.float32) + b3_ref[0]


def regression_model_forward(x, params, *, max_tile_b=MAX_TILE_B):
    """x: (B, INPUT_DIM) float32  ->  (B, 1) float32."""
    w1, b1, w2, b2, w3, b3 = params
    batch, feat = x.shape
    assert feat == INPUT_DIM

    tile_b, grid = _choose_tile(batch, max_tile_b)

    out_t = pl.pallas_call(
        mlp_kernel,
        out_shape=jax.ShapeDtypeStruct((OUT, batch), jnp.float32),
        grid=(grid,),
        in_specs=[
            pl.BlockSpec((tile_b, INPUT_DIM), lambda i: (i, 0)),  # x: streamed/pipelined
            pl.BlockSpec((H1, INPUT_DIM), lambda i: (0, 0)),      # weights/biases:
            pl.BlockSpec((H1, 1), lambda i: (0, 0)),              #   constant block ->
            pl.BlockSpec((H2, H1), lambda i: (0, 0)),             #   VMEM-resident,
            pl.BlockSpec((H2, 1), lambda i: (0, 0)),              #   no per-step DMA
            pl.BlockSpec((OUT, H2), lambda i: (0, 0)),
            pl.BlockSpec(memory_space=pltpu.MemorySpace.SMEM),    # b3 scalar in SMEM
        ],
        out_specs=pl.BlockSpec((OUT, tile_b), lambda i: (0, i)),
        compiler_params=pltpu.CompilerParams(
            dimension_semantics=("parallel",),   # batch grid shardable over 2 TCs (v7x)
            vmem_limit_bytes=32 * 1024 * 1024,   # explicit for v5e's 16 MiB default
        ),
    )(x.astype(jnp.float32), w1, b1, w2, b2, w3, b3)

    return out_t.T                                                    # (B, 1) f32


def init_params(key):
    k1, k2, k3 = jax.random.split(key, 3)
    w1 = _xavier_uniform(k1, H1, INPUT_DIM)
    b1 = jnp.zeros((H1, 1), jnp.float32)
    w2 = _xavier_uniform(k2, H2, H1)
    b2 = jnp.zeros((H2, 1), jnp.float32)
    w3 = _xavier_uniform(k3, OUT, H2)
    b3 = jnp.zeros((1,), jnp.float32)
    return (w1, b1, w2, b2, w3, b3)


def reference_forward(x, params):
    # Plain-JAX f32 reference matching torch's relu(fc1)->relu(fc2)->fc3.
    w1, b1, w2, b2, w3, b3 = params
    hp = jax.lax.Precision.HIGHEST
    h1 = jnp.maximum(jnp.dot(x, w1.T, precision=hp) + b1.T, 0.0)
    h2 = jnp.maximum(jnp.dot(h1, w2.T, precision=hp) + b2.T, 0.0)
    return jnp.dot(h2, w3.T, precision=hp) + b3


if __name__ == "__main__":
    key = jax.random.PRNGKey(0)
    pkey, xkey = jax.random.split(key)
    params = init_params(pkey)

    # Small batch: single full-array block, grid=(1,).
    B = 8
    x = jax.random.normal(xkey, (B, INPUT_DIM), jnp.float32)
    out = jax.block_until_ready(regression_model_forward(x, params))
    ref = reference_forward(x, params)
    assert out.shape == (B, OUT)
    assert jnp.allclose(out, ref, atol=1e-2, rtol=1e-2), \
        float(jnp.max(jnp.abs(out - ref)))

    # Ragged batch, default tiling: forced 2-step grid (v7x dual-TC path) with a
    # masked boundary block (300 rows over two 256-wide tiles).
    B2 = 300
    x2 = jax.random.normal(jax.random.PRNGKey(1), (B2, INPUT_DIM), jnp.float32)
    out2 = jax.block_until_ready(regression_model_forward(x2, params))
    ref2 = reference_forward(x2, params)
    assert out2.shape == (B2, OUT)
    assert jnp.allclose(out2, ref2, atol=1e-2, rtol=1e-2), \
        float(jnp.max(jnp.abs(out2 - ref2)))

    # Same batch with a small tile cap: 3-step grid + masked boundary block.
    out3 = jax.block_until_ready(
        regression_model_forward(x2, params, max_tile_b=128))
    assert out3.shape == (B2, OUT)
    assert jnp.allclose(out3, ref2, atol=1e-2, rtol=1e-2), \
        float(jnp.max(jnp.abs(out3 - ref2)))

    print("KERNEL_OK")
</pallas_src>

<mosaic_0001>
module attributes {stable_mosaic.version = 11 : i64} {
  func.func @mlp_kernel(%arg0: i32, %arg1: memref<8x10xf32, #tpu.memory_space<vmem>>, %arg2: memref<64x10xf32, #tpu.memory_space<vmem>>, %arg3: memref<64x1xf32, #tpu.memory_space<vmem>>, %arg4: memref<32x64xf32, #tpu.memory_space<vmem>>, %arg5: memref<32x1xf32, #tpu.memory_space<vmem>>, %arg6: memref<1x32xf32, #tpu.memory_space<vmem>>, %arg7: memref<1xf32, #tpu.memory_space<smem>>, %arg8: memref<1x8xf32, #tpu.memory_space<vmem>>) attributes {dimension_semantics = [#tpu.dimension_semantics<parallel>], iteration_bounds = array<i64: 1>, scalar_prefetch = 0 : i64, scratch_operands = 0 : i64, tpu.core_type = #tpu.core_type<tc>, window_params = [{transform_indices = @transform_0, window_bounds = array<i64: 8, 10>}, {pipeline_mode = #tpu.pipeline_mode<synchronous>, transform_indices = @transform_1, window_bounds = array<i64: 64, 10>}, {pipeline_mode = #tpu.pipeline_mode<synchronous>, transform_indices = @transform_2, window_bounds = array<i64: 64, 1>}, {pipeline_mode = #tpu.pipeline_mode<synchronous>, transform_indices = @transform_3, window_bounds = array<i64: 32, 64>}, {pipeline_mode = #tpu.pipeline_mode<synchronous>, transform_indices = @transform_4, window_bounds = array<i64: 32, 1>}, {pipeline_mode = #tpu.pipeline_mode<synchronous>, transform_indices = @transform_5, window_bounds = array<i64: 1, 32>}, {transform_indices = @transform_6, window_bounds = array<i64: 1>}, {transform_indices = @transform_7, window_bounds = array<i64: 1, 8>}]} {
    %c0 = arith.constant 0 : index
    %c0_0 = arith.constant 0 : index
    %0 = vector.load %arg1[%c0, %c0_0] : memref<8x10xf32, #tpu.memory_space<vmem>>, vector<8x10xf32>
    %c0_1 = arith.constant 0 : index
    %c0_2 = arith.constant 0 : index
    %1 = vector.load %arg2[%c0_1, %c0_2] : memref<64x10xf32, #tpu.memory_space<vmem>>, vector<64x10xf32>
    "tpu.trace_start"() <{level = 10 : i32, message = "hf,bf->hb"}> : () -> ()
    %cst = arith.constant dense<0.000000e+00> : vector<64x8xf32>
    %2 = tpu.matmul %1, %0, %cst {dimension_numbers = #tpu.dot_dimension_numbers<[1], [1], [0], [0], [0, 0, 1, 0], [], []>} : vector<64x10xf32>, vector<8x10xf32>, vector<64x8xf32> -> vector<64x8xf32>
    "tpu.trace_stop"() : () -> ()
    %c0_3 = arith.constant 0 : index
    %c0_4 = arith.constant 0 : index
    %3 = vector.load %arg3[%c0_3, %c0_4] : memref<64x1xf32, #tpu.memory_space<vmem>>, vector<64x1xf32>
    %4 = vector.broadcast %3 : vector<64x1xf32> to vector<64x8xf32>
    %5 = arith.addf %2, %4 : vector<64x8xf32>
    %cst_5 = arith.constant 0.000000e+00 : f32
    %6 = vector.broadcast %cst_5 : f32 to vector<64x8xf32>
    %7 = arith.maximumf %5, %6 : vector<64x8xf32>
    %c0_6 = arith.constant 0 : index
    %c0_7 = arith.constant 0 : index
    %8 = vector.load %arg4[%c0_6, %c0_7] : memref<32x64xf32, #tpu.memory_space<vmem>>, vector<32x64xf32>
    %cst_8 = arith.constant dense<0.000000e+00> : vector<32x8xf32>
    %9 = tpu.matmul %8, %7, %cst_8 {dimension_numbers = #tpu.dot_dimension_numbers<[1], [0], [0], [1], [0, 0, 1, 1], [], []>} : vector<32x64xf32>, vector<64x8xf32>, vector<32x8xf32> -> vector<32x8xf32>
    %c0_9 = arith.constant 0 : index
    %c0_10 = arith.constant 0 : index
    %10 = vector.load %arg5[%c0_9, %c0_10] : memref<32x1xf32, #tpu.memory_space<vmem>>, vector<32x1xf32>
    %11 = vector.broadcast %10 : vector<32x1xf32> to vector<32x8xf32>
    %12 = arith.addf %9, %11 : vector<32x8xf32>
    %cst_11 = arith.constant 0.000000e+00 : f32
    %13 = vector.broadcast %cst_11 : f32 to vector<32x8xf32>
    %14 = arith.maximumf %12, %13 : vector<32x8xf32>
    %c0_12 = arith.constant 0 : index
    %c0_13 = arith.constant 0 : index
    %15 = vector.load %arg6[%c0_12, %c0_13] : memref<1x32xf32, #tpu.memory_space<vmem>>, vector<1x32xf32>
    %cst_14 = arith.constant dense<0.000000e+00> : vector<1x8xf32>
    %16 = tpu.matmul %15, %14, %cst_14 {dimension_numbers = #tpu.dot_dimension_numbers<[1], [0], [0], [1], [0, 0, 1, 1], [], []>} : vector<1x32xf32>, vector<32x8xf32>, vector<1x8xf32> -> vector<1x8xf32>
    %c0_15 = arith.constant 0 : index
    %17 = memref.load %arg7[%c0_15] : memref<1xf32, #tpu.memory_space<smem>>
    %18 = vector.broadcast %17 : f32 to vector<1x8xf32>
    %19 = arith.addf %16, %18 : vector<1x8xf32>
    %c0_16 = arith.constant 0 : index
    %c0_17 = arith.constant 0 : index
    %20 = vector.load %arg8[%c0_16, %c0_17] : memref<1x8xf32, #tpu.memory_space<vmem>>, vector<1x8xf32>
    tpu.vector_store %arg8[%c0_16, %c0_17], %19 {strides = array<i32>} : memref<1x8xf32, #tpu.memory_space<vmem>>, vector<1x8xf32>,
    return
  }
  func.func @transform_0(%arg0: i32) -> (i32, i32) {
    %c0_i32 = arith.constant 0 : i32
    %c0_i32_0 = arith.constant 0 : i32
    return %arg0, %c0_i32 : i32, i32
  }
  func.func @transform_1(%arg0: i32) -> (i32, i32) {
    %c0_i32 = arith.constant 0 : i32
    %c0_i32_0 = arith.constant 0 : i32
    %c0_i32_1 = arith.constant 0 : i32
    return %c0_i32, %c0_i32_0 : i32, i32
  }
  func.func @transform_2(%arg0: i32) -> (i32, i32) {
    %c0_i32 = arith.constant 0 : i32
    %c0_i32_0 = arith.constant 0 : i32
    %c0_i32_1 = arith.constant 0 : i32
    return %c0_i32, %c0_i32_0 : i32, i32
  }
  func.func @transform_3(%arg0: i32) -> (i32, i32) {
    %c0_i32 = arith.constant 0 : i32
    %c0_i32_0 = arith.constant 0 : i32
    %c0_i32_1 = arith.constant 0 : i32
    return %c0_i32, %c0_i32_0 : i32, i32
  }
  func.func @transform_4(%arg0: i32) -> (i32, i32) {
    %c0_i32 = arith.constant 0 : i32
    %c0_i32_0 = arith.constant 0 : i32
    %c0_i32_1 = arith.constant 0 : i32
    return %c0_i32, %c0_i32_0 : i32, i32
  }
  func.func @transform_5(%arg0: i32) -> (i32, i32) {
    %c0_i32 = arith.constant 0 : i32
    %c0_i32_0 = arith.constant 0 : i32
    %c0_i32_1 = arith.constant 0 : i32
    return %c0_i32, %c0_i32_0 : i32, i32
  }
  func.func @transform_6(%arg0: i32) -> i32 {
    %c0_i32 = arith.constant 0 : i32
    %c0_i32_0 = arith.constant 0 : i32
    return %c0_i32 : i32
  }
  func.func @transform_7(%arg0: i32) -> (i32, i32) {
    %c0_i32 = arith.constant 0 : i32
    %c0_i32_0 = arith.constant 0 : i32
    return %c0_i32, %arg0 : i32, i32
  }
}

</mosaic_0001>

<bundles_post_ra>
// kernel: tpu_custom_call.1
= control target key start
LH: loop header
LB: loop body
LE: loop exit
PB: predicated region body
PF: predicated region fallthrough
CT: control target
= control target key end

     0   :  { %vm85_vm0 = vcmask 80896   ;;  %v589_v3 = vmov 0   ;;  %s741_s0 = inlined_call_operand.vmem [shape: f32[8,10], index: 0, kind: input, shape index: {}]   ;;  %s742_s1 = inlined_call_operand.vmem [shape: f32[64,10], index: 1, kind: input, shape index: {}]   ;;  %s743_s2 = inlined_call_operand.vmem [shape: f32[64,1], index: 2, kind: input, shape index: {}]   ;;  %s744_s3 = inlined_call_operand.vmem [shape: f32[32,64], index: 3, kind: input, shape index: {}]   ;;  %s745_s4 = inlined_call_operand.vmem [shape: f32[32,1], index: 4, kind: input, shape index: {}]   ;;  %s746_s5 = inlined_call_operand.vmem [shape: f32[1,32], index: 5, kind: input, shape index: {}]   ;;  %s747_s6 = inlined_call_operand.<no memory space> [shape: f32[1], index: 6, kind: input, shape index: {}]   ;;  %s748_s7 = inlined_call_operand.hbm [shape: f32[1,8], index: 7, kind: output, shape index: {}]  }
   0x1   :  { %v28_v0 = vld [vmem:[%s741_s0] sm:$0xff]  ;;  %v30_v2 = vld [vmem:[%s742_s1 + $0x8] sm:$0xff]  ;;  %563 = vset.pattern.permute.xlu0 %v589_v3  ;;  %v31_v4 = vld [vmem:[%s742_s1 + $0x10] sm:$0xff]  ;;  %564 = vset.pattern.permute.xlu1 %v589_v3 }
   0x2   :  { %v29_v1 = vld [vmem:[%s742_s1] sm:$0xff]  ;;  %489 = vmatprep.subr.msk.mxu0 %vm85_vm0, %v28_v0  ;;  %v39_v6 = vld [vmem:[%s743_s2 + $0x10] sm:$0xff]  ;;  %v38_v7 = vld [vmem:[%s743_s2 + $0x8] sm:$0xff] }
   0x3   :  { %491 = vmatprep.mubr.msk.f32.mxu0 %vm85_vm0, %v29_v1  ;;  %490 = vmatpush3.xpose.msk.msra.mxu0 %vm85_vm0, %v28_v0  ;;  %v37_v5 = vld [vmem:[%s743_s2] sm:$0xff]  ;;  %v40_v8 = vld [vmem:[%s743_s2 + $0x18] sm:$0xff] }
   0x4   :  { %47 = vperm.xlu0 %563, %v37_v5   ;;  %57 = vperm.xlu1 %564, %v39_v6   ;;  %v32_v9 = vld [vmem:[%s742_s1 + $0x18] sm:$0xff]  ;;  %v33_v10 = vld [vmem:[%s742_s1 + $0x20] sm:$0xff] }
   0x6   :  { %492 = vmatmul.mubr.msk.f32.vlgmr.msra.gmra.mrb[0].mxu0 %vm85_vm0, %v30_v2 }
   0x7   :  { %494 = vmatprep.mubr.msk.f32.mxu0 %vm85_vm0, %v31_v4 }
   0x8   :  { %13 = vsyncpa [#allocation4], 0  ;;  %52 = vperm.xlu0 %563, %v38_v7   ;;  %62 = vperm.xlu1 %564, %v40_v8   ;;  %v41_v11 = vld [vmem:[%s743_s2 + $0x20] sm:$0xff]  ;;  %v42_v12 = vld [vmem:[%s743_s2 + $0x28] sm:$0xff]  ;;  %vm254_vm1 = vcmask 523264   ;;  %v590_v62 = vmov 0.0|0.0  }
   0x9   :  { %v34_v13 = vld [vmem:[%s742_s1 + $0x28] sm:$0xff]  ;;  %v35_v14 = vld [vmem:[%s742_s1 + $0x30] sm:$0xff]  ;;  %v44_v16 = vld [vmem:[%s743_s2 + $0x38] sm:$0xff]  ;;  %552 = vmatprep.subr.bf16.mxu0 %v590_v62  ;;  %vm591_vm2 = vmmov 0   ;;  %v592_v63 = vmov 0.0   ;;  %vm359_vm3 = vcmask 261120  }
   0xa   :  { %495 = vmatmul.mubr.msk.f32.gmra.mrb[2].mxu0 %vm85_vm0, %v32_v9  ;;  %v43_v15 = vld [vmem:[%s743_s2 + $0x30] sm:$0xff]  ;;  %v36_v17 = vld [vmem:[%s742_s1 + $0x38] sm:$0xff]  ;;  %v230_v18 = vld [vmem:[%s745_s4] sm:$0xff]  ;;  %s593_s26 = smov [#allocation3]   ;;  %vm433_vm4 = vcmask 57344  }
   0xb   :  { %497 = vmatprep.mubr.msk.f32.mxu0 %vm85_vm0, %v33_v10  ;;  %v231_v19 = vld [vmem:[%s745_s4 + $0x8] sm:$0xff]  ;;  %v232_v20 = vld [vmem:[%s745_s4 + $0x10] sm:$0xff]  ;;  %v233_v21 = vld [vmem:[%s745_s4 + $0x18] sm:$0xff]  ;;  %s441_s27 = sshll.u32 %s593_s26, 4  ;;  %s442_s27 = int_to_ptr.vmem [resolvable:$true] %s441_s27 }
   0xc   :  { %67 = vperm.xlu0 %563, %v41_v11   ;;  %72 = vperm.xlu1 %564, %v42_v12   ;;  %v226_v22 = vld [vmem:[%s744_s3] sm:$0xff]  ;;  %v227_v59 = vld [vmem:[%s744_s3 + $0x8] sm:$0xff]  ;;  %v228_v60 = vld [vmem:[%s744_s3 + $0x10] sm:$0xff]  ;;  %s565_s28 = scalar_lea.vmem %s442_s27, 16  ;;  %s569_s29 = scalar_lea.vmem %s442_s27, 32 }
   0xd   :  { %519 = vmatprep.mubr.msk.f32.mxu1 %vm254_vm1, %v226_v22  ;;  %v229_v61 = vld [vmem:[%s744_s3 + $0x18] sm:$0xff]  ;;  %p566_p0 = scmp.ne.s32.totalorder %s442_s27, %s565_s28  ;;  %p570_p1 = scmp.lt.s32.totalorder %s442_s27, %s442_s27 }
   0xe   :  { %498 = vmatmul.mubr.msk.f32.gmra.mrb[4].mxu0 %vm85_vm0, %v34_v13  ;;  %p571_p2 = scmp.lt.s32.totalorder %s569_s29, %s565_s28 }
   0xf   :  { %500 = vmatprep.mubr.msk.f32.mxu0 %vm85_vm0, %v35_v14 }
  0x10   :  { %77 = vperm.xlu0 %563, %v43_v15   ;;  %82 = vperm.xlu1 %564, %v44_v16   ;;  %p572_p3 = por %p571_p2, %p570_p1 }
  0x12   :  { %501 = vmatmul.mubr.msk.f32.gmra.mrb[6].mxu0 %vm85_vm0, %v36_v17  ;;  %p573_p4 = pnand %p572_p3, %p566_p0 }
  0x13   :  { %533 = vmatprep.mubr.msk.f32.mxu0 %vm591_vm2, %v592_v63 }
  0x14   :  { %236 = vperm.xlu0 %563, %v230_v18   ;;  %241 = vperm.xlu1 %564, %v231_v19   ;;  %v356_v18 = vld [vmem:[%s746_s5] sm:$0x1]  ;;  %v358_v19 = vstv %s747_s6 }
  0x18   :  { %246 = vperm.xlu0 %563, %v232_v20   ;;  %251 = vperm.xlu1 %564, %v233_v21  }
  0x83   :  { %v48_v23 = vpop.permute.xlu0 %47  ;;  %v58_v24 = vpop.permute.xlu1 %57 }
  0x87   :  { %v53_v25 = vpop.permute.xlu0 %52  ;;  %v63_v26 = vpop.permute.xlu1 %62 }
  0x8b   :  { %v73_v36 = vpop.permute.xlu1 %72  ;;  %v68_v39 = vpop.permute.xlu0 %67 }
  0x8f   :  { %v83_v48 = vpop.permute.xlu1 %82  ;;  %v78_v51 = vpop.permute.xlu0 %77 }
  0x93   :  { %v242_v0 = vpop.permute.xlu1 %241  ;;  %v237_v1 = vpop.permute.xlu0 %236 }
  0x97   :  { %v252_v7 = vpop.permute.xlu1 %251  ;;  %v247_v10 = vpop.permute.xlu0 %246 }
  0xd9   :  { %v493_v27 = vpop.f32.mrb[0].mxu0 }
  0xda   :  { %v185_v28 = vadd.f32 %v493_v27, %v53_v25  ;;  %v179_v29 = vpop.f32.mrb[1].mxu0 }
  0xdb   :  { %v180_v30 = vadd.f32 %v179_v29, %v48_v23 }
  0xdc   :  { %v219_v31 = vmax.f32 %v185_v28, 0.0 }
  0xdd   :  { %v218_v32 = vmax.f32 %v180_v30, 0.0  ;;  %v496_v33 = vpop.f32.mrb[2].mxu0 }
  0xde   :  { %v195_v34 = vadd.f32 %v496_v33, %v63_v26  ;;  %v189_v35 = vpop.f32.mrb[3].mxu0 }
  0xdf   :  { %v190_v37 = vadd.f32 %v189_v35, %v58_v24  ;;  %v536_v38 = vpack.c.bf16 %v219_v31, %v218_v32 }
  0xe0   :  { %v221_v40 = vmax.f32 %v195_v34, 0.0 }
  0xe1   :  { %v220_v41 = vmax.f32 %v190_v37, 0.0  ;;  %v499_v42 = vpop.f32.mrb[4].mxu0  ;;  %537 = vmatprep.subr.bf16.mxu1 %v536_v38 }
  0xe2   :  { %v205_v43 = vadd.f32 %v499_v42, %v73_v36  ;;  %v199_v44 = vpop.f32.mrb[5].mxu0  ;;  %539 = vmatpush3.bf16.msra.mxu1 %v536_v38 }
  0xe3   :  { %v540_v45 = vpack.c.bf16 %v221_v40, %v220_v41  ;;  %v200_v46 = vadd.f32 %v199_v44, %v68_v39 }
  0xe4   :  { %v223_v47 = vmax.f32 %v205_v43, 0.0 }
  0xe5   :  { %v222_v49 = vmax.f32 %v200_v46, 0.0  ;;  %v502_v50 = vpop.f32.mrb[6].mxu0  ;;  %541 = vmatprep.subr.bf16.mxu1 %v540_v45 }
  0xe6   :  { %v215_v52 = vadd.f32 %v502_v50, %v83_v48  ;;  %v209_v53 = vpop.f32.mrb[7].mxu0  ;;  %543 = vmatpush3.bf16.msra.mxu1 %v540_v45 }
  0xe7   :  { %v544_v54 = vpack.c.bf16 %v223_v47, %v222_v49  ;;  %v210_v55 = vadd.f32 %v209_v53, %v78_v51 }
  0xe8   :  { %v225_v56 = vmax.f32 %v215_v52, 0.0 }
  0xe9   :  { %v224_v57 = vmax.f32 %v210_v55, 0.0  ;;  %545 = vmatprep.subr.bf16.mxu1 %v544_v54 }
  0xea   :  { %547 = vmatpush3.bf16.msra.mxu1 %v544_v54 }
  0xeb   :  { %v548_v58 = vpack.c.bf16 %v225_v56, %v224_v57 }
  0xed   :  { %549 = vmatprep.subr.bf16.mxu1 %v548_v58 }
  0xee   :  { %551 = vmatpush3.bf16.msra.mxu1 %v548_v58 }
  0xf1   :  { %520 = vmatmul.mubr.msk.f32.vlgmr.msra.gmra.mrb[0].mxu1 %vm254_vm1, %v227_v59 }
  0xf2   :  { %522 = vmatprep.mubr.msk.f32.mxu1 %vm254_vm1, %v228_v60 }
  0xf5   :  { %523 = vmatmul.mubr.msk.f32.gmra.mrb[2].mxu1 %vm254_vm1, %v229_v61 }
 0x1c4   :  { %v521_v2 = vpop.f32.mrb[0].mxu1 }
 0x1c5   :  { %v339_v3 = vadd.f32 %v521_v2, %v242_v0  ;;  %v333_v4 = vpop.f32.mrb[1].mxu1 }
 0x1c6   :  { %v334_v5 = vadd.f32 %v333_v4, %v237_v1 }
 0x1c7   :  { %v353_v6 = vmax.f32 %v339_v3, 0.0 }
 0x1c8   :  { %v352_v8 = vmax.f32 %v334_v5, 0.0  ;;  %v524_v9 = vpop.f32.mrb[2].mxu1 }
 0x1c9   :  { %v349_v11 = vadd.f32 %v524_v9, %v252_v7  ;;  %v343_v12 = vpop.f32.mrb[3].mxu1 }
 0x1ca   :  { %v553_v13 = vpack.c.bf16 %v353_v6, %v352_v8  ;;  %v344_v14 = vadd.f32 %v343_v12, %v247_v10 }
 0x1cb   :  { %v355_v15 = vmax.f32 %v349_v11, 0.0 }
 0x1cc   :  { %v354_v16 = vmax.f32 %v344_v14, 0.0  ;;  %554 = vmatpush3.bf16.msra.mxu0 %v553_v13 }
 0x1cd   :  { %555 = vmatprep.subr.bf16.mxu0 %v590_v62 }
 0x1ce   :  { %v556_v17 = vpack.c.bf16 %v355_v15, %v354_v16 }
 0x1d0   :  { %557 = vmatpush3.bf16.msra.mxu0 %v556_v17 }
 0x1d3   :  { %534 = vmatmul.mubr.msk.f32.vlgmr.msra.gmra.mrb[8].mxu0 %vm359_vm3, %v356_v18 }
 0x2a6   :  { %v429_v20 = vpop.f32.mrb[8].mxu0 }
 0x2a7   :  { %v430_v21 = vadd.f32 %v429_v20, %v358_v19  ;;  %v535_v22 = vpop.f32.mrb[9].mxu0 }
 0x2a9   :  { %434 = vst.msk [vmem:[#allocation3] sm:$0x1] %vm433_vm4, %v430_v21 }
 0x2aa   :  { %576 = shalt.err (!%p573_p4)
}
 0x2ab   :  { %s577_s6 = scalar_lea.hbm %s748_s7, 16 }
 0x2ac   :  { %p578_p5 = scmp.ne.s32.totalorder %s748_s7, %s577_s6  ;;  %p581_p6 = scmp.lt.u32.totalorder %s577_s6, %s748_s7 }
 0x2ae   :  { %p583_p7 = pnand %p581_p6, %p578_p5 }
 0x2b0   :  { %586 = shalt.err (!%p583_p7)
}
 0x2b1   :  { %444 = dma.vmem_to_hbm [thread:$0]  %s442_s27, 16, %s748_s7, [#allocation4]  }
 0x2b2   :  { %587 = dma.done.wait [#allocation4], 16  }
 0x2b3   :  { %588 = vsyncadd [#allocation4], 4294967280 }
 0x2b4   :  { %448 = vsyncpa [#allocation4], 1 }

</bundles_post_ra>
